<compile_context>
chip_gen: v7x
topology: tpu7x:2x2x1
jax: 0.10.0
libtpu: 0.0.40
codegen_flags: <defaults>
</compile_context>

<pallas_src>
import jax
import jax.numpy as jnp
import numpy as np
from jax.experimental import pallas as pl
from jax.experimental.pallas import tpu as pltpu

EPS = 1e-5                         # nn.BatchNorm2d default
_LANE_TILE_CAP = 2048              # lane tile cap (multiple of 128)
_TILE_BYTES_CAP = 2 * 1024 * 1024  # per-x-tile VMEM budget


def _pick_tile(total, unit, cap):
    """Largest multiple of `unit` that divides `total` and is <= cap.

    Falls back to the full extent (always a legal block size) if total <= cap or if
    no such divisor exists.
    """
    if total <= cap:
        return total
    if total % unit:
        return total  # full-extent block
    best = total
    for t in range(unit, cap + 1, unit):
        if total % t == 0:
            best = t
    return best


def _stats_kernel(x_ref, sum_ref, sumsq_ref):
    # x_ref:   [tr, thw] tile of the [N*C, HW] view (native dtype in VMEM).
    # sum_ref / sumsq_ref: [tr, 1] f32 output blocks, resident across the HW
    # reduction axis (their index_map is constant in the hw grid index).
    @pl.when(pl.program_id(1) == 0)
    def _():
        sum_ref[...] = jnp.zeros_like(sum_ref)
        sumsq_ref[...] = jnp.zeros_like(sumsq_ref)

    x = x_ref[...].astype(jnp.float32)            # per-vreg upcast in the VPU path
    sum_ref[...] += jnp.sum(x, axis=1, keepdims=True)
    sumsq_ref[...] += jnp.sum(x * x, axis=1, keepdims=True)


def _apply_kernel(x_ref, scale_ref, shift_ref, o_ref):
    # out[r, :] = scale[r] * x[r, :] + shift[r]
    x = x_ref[...].astype(jnp.float32)
    o_ref[...] = (x * scale_ref[...] + shift_ref[...]).astype(o_ref.dtype)


def conditional_batch_norm2d(x, y, embed_weight, num_features):
    """x: [N, C, H, W] float; y: [N] int class ids; embed_weight: [num_classes, 2*C]."""
    N, C, H, W = x.shape
    assert C == num_features
    HW = H * W
    NC = N * C
    itemsize = jnp.dtype(x.dtype).itemsize

    # Lane-dense tiles: thw multiple of 128 (unmasked vst), tr multiple of 8 sublanes.
    thw = _pick_tile(HW, 128, _LANE_TILE_CAP)
    max_rows = max(8, _TILE_BYTES_CAP // max(1, thw * itemsize))
    tr = _pick_tile(NC, 8, max_rows)
    tile_bytes = tr * thw * itemsize
    # Explicit, modest VMEM budget (double-buffered in + out tiles + slack); never
    # relies on v6e's 128 MiB physical VMEM.
    vmem_limit = int(min(96 << 20, max(16 << 20, 8 * tile_bytes)))

    x2 = x.reshape(NC, HW)
    grid = (NC // tr, HW // thw)

    # ---- Pass 1: per-row sum / sum-of-squares (single read of x) -------------
    row_sum, row_sumsq = pl.pallas_call(
        _stats_kernel,
        out_shape=(jax.ShapeDtypeStruct((NC, 1), jnp.float32),
                   jax.ShapeDtypeStruct((NC, 1), jnp.float32)),
        grid=grid,
        in_specs=[pl.BlockSpec((tr, thw), lambda r, h: (r, h))],
        out_specs=(pl.BlockSpec((tr, 1), lambda r, h: (r, 0)),
                   pl.BlockSpec((tr, 1), lambda r, h: (r, 0))),
        compiler_params=pltpu.CompilerParams(
            dimension_semantics=("parallel", "arbitrary"),
            vmem_limit_bytes=vmem_limit),
    )(x2)

    # ---- Tiny glue in plain JAX: channel stats + conditional scale/shift -----
    cnt = jnp.float32(N * HW)
    ch_sum = row_sum.reshape(N, C).sum(axis=0)
    ch_sumsq = row_sumsq.reshape(N, C).sum(axis=0)
    mean = ch_sum / cnt
    var = ch_sumsq / cnt - mean * mean            # biased variance (training-mode BN)
    inv_std = jax.lax.rsqrt(var + EPS)

    emb = jnp.take(embed_weight, y, axis=0).astype(jnp.float32)   # [N, 2C]
    gamma = emb[:, :num_features]                                 # [N, C]
    beta = emb[:, num_features:]                                  # [N, C]
    scale = gamma * inv_std[None, :]                              # [N, C]
    shift = beta - scale * mean[None, :]                          # [N, C]
    scale2 = scale.reshape(NC, 1)
    shift2 = shift.reshape(NC, 1)

    # ---- Pass 2: out = scale * x + shift (read x once, write once) -----------
    out2 = pl.pallas_call(
        _apply_kernel,
        out_shape=jax.ShapeDtypeStruct((NC, HW), x.dtype),
        grid=grid,
        in_specs=[pl.BlockSpec((tr, thw), lambda r, h: (r, h)),
                  pl.BlockSpec((tr, 1), lambda r, h: (r, 0)),
                  pl.BlockSpec((tr, 1), lambda r, h: (r, 0))],
        out_specs=pl.BlockSpec((tr, thw), lambda r, h: (r, h)),
        compiler_params=pltpu.CompilerParams(
            dimension_semantics=("parallel", "parallel"),
            vmem_limit_bytes=vmem_limit),
    )(x2, scale2, shift2)

    return out2.reshape(N, C, H, W)


def _reference(x, y, embed_weight, num_features):
    # Pure-JAX reference mirroring the PyTorch forward (training-mode BN).
    emb = jnp.take(embed_weight, y, axis=0)
    gamma = emb[:, :num_features][:, :, None, None]
    beta = emb[:, num_features:][:, :, None, None]
    mean = jnp.mean(x, axis=(0, 2, 3), keepdims=True)
    var = jnp.mean((x - mean) ** 2, axis=(0, 2, 3), keepdims=True)
    x_hat = (x - mean) / jnp.sqrt(var + EPS)
    return gamma * x_hat + beta


if __name__ == "__main__":
    num_features = 4
    num_classes = 10
    N, H, W = 2, 16, 16

    key = jax.random.PRNGKey(0)
    kx, ke, ky = jax.random.split(key, 3)

    # Deterministic parameter init, matching the module's __init__:
    #   embed.weight[:, :C] ~ Normal(1, 0.02), embed.weight[:, C:] = 0
    gamma_part = 1.0 + 0.02 * jax.random.normal(ke, (num_classes, num_features), jnp.float32)
    beta_part = jnp.zeros((num_classes, num_features), jnp.float32)
    embed_weight = jnp.concatenate([gamma_part, beta_part], axis=1)   # [num_classes, 2C]

    x = jax.random.normal(kx, (N, num_features, H, W), jnp.float32)
    y = jax.random.randint(ky, (N,), 0, num_classes)

    out = conditional_batch_norm2d(x, y, embed_weight, num_features)
    out = jax.block_until_ready(out)

    ref = _reference(x, y, embed_weight, num_features)
    np.testing.assert_allclose(np.asarray(out), np.asarray(ref), rtol=1e-5, atol=1e-5)

    print("KERNEL_OK")
</pallas_src>

<mosaic_0001>
module attributes {stable_mosaic.version = 11 : i64} {
  func.func @_stats_kernel(%arg0: i32, %arg1: i32, %arg2: memref<8x256xf32, #tpu.memory_space<vmem>>, %arg3: memref<8x1xf32, #tpu.memory_space<vmem>>, %arg4: memref<8x1xf32, #tpu.memory_space<vmem>>) attributes {dimension_semantics = [#tpu.dimension_semantics<parallel>, #tpu.dimension_semantics<arbitrary>], iteration_bounds = array<i64: 1, 1>, scalar_prefetch = 0 : i64, scratch_operands = 0 : i64, tpu.core_type = #tpu.core_type<tc>, window_params = [{transform_indices = @transform_0, window_bounds = array<i64: 8, 256>}, {transform_indices = @transform_1, window_bounds = array<i64: 8, 1>}, {transform_indices = @transform_2, window_bounds = array<i64: 8, 1>}]} {
    %c0_i32 = arith.constant 0 : i32
    %0 = arith.cmpi eq, %arg1, %c0_i32 : i32
    %1 = arith.extui %0 : i1 to i32
    %c0_i32_0 = arith.constant 0 : i32
    %2 = arith.cmpi ne, %1, %c0_i32_0 : i32
    scf.if %2 {
      %cst_11 = arith.constant 0.000000e+00 : f32
      %15 = vector.broadcast %cst_11 : f32 to vector<8x1xf32>
      %c0_12 = arith.constant 0 : index
      %c0_13 = arith.constant 0 : index
      %16 = vector.load %arg3[%c0_12, %c0_13] : memref<8x1xf32, #tpu.memory_space<vmem>>, vector<8x1xf32>
      tpu.vector_store %arg3[%c0_12, %c0_13], %15 {strides = array<i32>} : memref<8x1xf32, #tpu.memory_space<vmem>>, vector<8x1xf32>,
      %cst_14 = arith.constant 0.000000e+00 : f32
      %17 = vector.broadcast %cst_14 : f32 to vector<8x1xf32>
      %c0_15 = arith.constant 0 : index
      %c0_16 = arith.constant 0 : index
      %18 = vector.load %arg4[%c0_15, %c0_16] : memref<8x1xf32, #tpu.memory_space<vmem>>, vector<8x1xf32>
      tpu.vector_store %arg4[%c0_15, %c0_16], %17 {strides = array<i32>} : memref<8x1xf32, #tpu.memory_space<vmem>>, vector<8x1xf32>,
    } else {
    }
    %c0 = arith.constant 0 : index
    %c0_1 = arith.constant 0 : index
    %3 = vector.load %arg2[%c0, %c0_1] : memref<8x256xf32, #tpu.memory_space<vmem>>, vector<8x256xf32>
    %c0_2 = arith.constant 0 : index
    %c0_3 = arith.constant 0 : index
    %4 = vector.load %arg3[%c0_2, %c0_3] : memref<8x1xf32, #tpu.memory_space<vmem>>, vector<8x1xf32>
    %cst = arith.constant dense<0.000000e+00> : vector<8xf32>
    %5 = vector.multi_reduction <add>, %3, %cst [1] : vector<8x256xf32> to vector<8xf32>
    %6 = vector.shape_cast %5 : vector<8xf32> to vector<8x1xf32>
    %7 = arith.addf %4, %6 : vector<8x1xf32>
    %c0_4 = arith.constant 0 : index
    %c0_5 = arith.constant 0 : index
    %8 = vector.load %arg3[%c0_4, %c0_5] : memref<8x1xf32, #tpu.memory_space<vmem>>, vector<8x1xf32>
    tpu.vector_store %arg3[%c0_4, %c0_5], %7 {strides = array<i32>} : memref<8x1xf32, #tpu.memory_space<vmem>>, vector<8x1xf32>,
    %c0_6 = arith.constant 0 : index
    %c0_7 = arith.constant 0 : index
    %9 = vector.load %arg4[%c0_6, %c0_7] : memref<8x1xf32, #tpu.memory_space<vmem>>, vector<8x1xf32>
    %10 = arith.mulf %3, %3 : vector<8x256xf32>
    %cst_8 = arith.constant dense<0.000000e+00> : vector<8xf32>
    %11 = vector.multi_reduction <add>, %10, %cst_8 [1] : vector<8x256xf32> to vector<8xf32>
    %12 = vector.shape_cast %11 : vector<8xf32> to vector<8x1xf32>
    %13 = arith.addf %9, %12 : vector<8x1xf32>
    %c0_9 = arith.constant 0 : index
    %c0_10 = arith.constant 0 : index
    %14 = vector.load %arg4[%c0_9, %c0_10] : memref<8x1xf32, #tpu.memory_space<vmem>>, vector<8x1xf32>
    tpu.vector_store %arg4[%c0_9, %c0_10], %13 {strides = array<i32>} : memref<8x1xf32, #tpu.memory_space<vmem>>, vector<8x1xf32>,
    return
  }
  func.func @transform_0(%arg0: i32, %arg1: i32) -> (i32, i32) {
    %c0_i32 = arith.constant 0 : i32
    return %arg0, %arg1 : i32, i32
  }
  func.func @transform_1(%arg0: i32, %arg1: i32) -> (i32, i32) {
    %c0_i32 = arith.constant 0 : i32
    %c0_i32_0 = arith.constant 0 : i32
    return %arg0, %c0_i32 : i32, i32
  }
  func.func @transform_2(%arg0: i32, %arg1: i32) -> (i32, i32) {
    %c0_i32 = arith.constant 0 : i32
    %c0_i32_0 = arith.constant 0 : i32
    return %arg0, %c0_i32 : i32, i32
  }
}

</mosaic_0001>

<bundles_post_ra>
// kernel: tpu_custom_call.1
= control target key start
LH: loop header
LB: loop body
LE: loop exit
PB: predicated region body
PF: predicated region fallthrough
CT: control target
= control target key end

     0   :  { %8 = vsyncpa [#allocation3], 0  ;;  %s81_s9 = smov [#allocation2]   ;;  %s132_s0 = inlined_call_operand.hbm [shape: f32[8,256], index: 0, kind: input, shape index: {}]   ;;  %s133_s1 = inlined_call_operand.vmem [shape: f32[8,1], index: 1, kind: output, shape index: {0}]   ;;  %s134_s2 = inlined_call_operand.vmem [shape: f32[8,1], index: 2, kind: output, shape index: {1}]  }
   0x1   :  { %s15_s10 = sshll.u32 %s81_s9, 4  ;;  %s57_s13 = scalar_lea.hbm %s132_s0, 256  ;;  %s16_s10 = int_to_ptr.vmem [resolvable:$true] %s15_s10 }
   0x2   :  { %p58_p0 = scmp.ne.s32.totalorder %s132_s0, %s57_s13  ;;  %p61_p1 = scmp.lt.u32.totalorder %s57_s13, %s132_s0 }
   0x4   :  { %p63_p2 = pnand %p61_p1, %p58_p0 }
   0x6   :  { %66 = shalt.err (!%p63_p2)
}
   0x7   :  { %s67_s18 = scalar_lea.vmem %s16_s10, 256  ;;  %p72_p4 = scmp.lt.s32.totalorder %s16_s10, %s16_s10 }
   0x8   :  { %p68_p3 = scmp.ne.s32.totalorder %s16_s10, %s67_s18  ;;  %p73_p5 = scmp.lt.s32.totalorder %s67_s18, %s67_s18 }
   0xa   :  { %p74_p6 = por %p73_p5, %p72_p4 }
   0xc   :  { %p75_p7 = pnand %p74_p6, %p68_p3 }
   0xe   :  { %78 = shalt.err (!%p75_p7)
}
   0xf   :  { %18 = dma.hbm_to_vmem [thread:$0]  %s132_s0, 256, %s16_s10, [#allocation3]  }
  0x10   :  { %79 = dma.done.wait [#allocation3], 256  }
  0x11   :  { %80 = vsyncadd [#allocation3], 4294967040  ;;  %vm26_vm0 = vcmask 7168   ;;  %v82_v0 = vmov 0.0   ;;  %v29_v1 = vld [vmem:[#allocation2] sm:$0xff]  ;;  %v30_v2 = vld [vmem:[#allocation2 + $0x8] sm:$0xff] }
  0x12   :  { %27 = vst.msk [vmem:[%s133_s1] sm:$0xff] %vm26_vm0, %v82_v0  ;;  %28 = vst.msk [vmem:[%s134_s2] sm:$0xff] %vm26_vm0, %v82_v0  ;;  %v32_v3 = vadd.f32 %v30_v2, %v29_v1  ;;  %v39_v4 = vmul.f32 %v29_v1, %v29_v1  ;;  %v40_v5 = vmul.f32 %v30_v2, %v30_v2 }
  0x14   :  { %33 = vadd.xlane.f32.xlu0 %v32_v3  ;;  %v41_v6 = vadd.f32 %v40_v5, %v39_v4 }
  0x18   :  { %42 = vadd.xlane.f32.xlu0 %v41_v6 }
  0x19   :  { %v31_v7 = vld [vmem:[%s133_s1] sm:$0xff] }
  0x1a   :  { %v38_v10 = vld [vmem:[%s134_s2] sm:$0xff] }
  0xa1   :  { %v34_v8 = vpop.xlane.xlu0 %33 }
  0xa2   :  { %v35_v9 = vadd.f32 %v34_v8, %v31_v7 }
  0xa4   :  { %37 = vst.msk [vmem:[%s133_s1] sm:$0xff] %vm26_vm0, %v35_v9 }
  0xa5   :  { %v43_v11 = vpop.xlane.xlu0 %42 }
  0xa6   :  { %v44_v12 = vadd.f32 %v43_v11, %v38_v10 }
  0xa8   :  { %45 = vst.msk [vmem:[%s134_s2] sm:$0xff] %vm26_vm0, %v44_v12 }
  0xa9   :  { %54 = vsyncpa [#allocation3], 1 }

</bundles_post_ra>
